<compile_context>
chip_gen: v7x
topology: tpu7x:2x2x1
jax: 0.10.0
libtpu: 0.0.40
codegen_flags: <defaults>
</compile_context>

<pallas_src>
import jax
import jax.numpy as jnp
from jax.experimental import pallas as pl
from jax.experimental.pallas import tpu as pltpu


def _round_up(x, m):
    return pl.cdiv(x, m) * m


# ----------------------------------------------------------------------------
# Kernel
# ----------------------------------------------------------------------------
def rbbox_head_kernel(x_ref, w1_ref, b1_ref, w2_ref, b2_ref, wh_ref, bh_ref,
                      out_ref, acc_ref):
    """Grid = (ROI tiles, K tiles over in_dim).

    x_ref  : (TM, TK)        f32   streamed, cast to bf16 in-kernel
    w1_ref : (TK, FC)        bf16  streamed along K
    b1/b2  : (1, FC)         f32   resident (Buffered(1))
    w2_ref : (FC, FC)        bf16  resident (Buffered(1))
    wh_ref : (FC, HEAD_PAD)  bf16  resident fused cls||reg head (Buffered(1))
    bh_ref : (1, HEAD_PAD)   f32   resident (Buffered(1))
    out_ref: (TM, HEAD_PAD)  f32   written on the last K step
    acc_ref: (TM, FC)        f32   FC1 accumulator scratch
    """
    k = pl.program_id(1)

    @pl.when(k == 0)
    def _():
        acc_ref[...] = jnp.zeros_like(acc_ref)

    # FC1 partial product for this K chunk (f32 accumulation on the MXU).
    acc_ref[...] += jnp.dot(x_ref[...].astype(jnp.bfloat16), w1_ref[...],
                            preferred_element_type=jnp.float32)

    @pl.when(k == pl.num_programs(1) - 1)
    def _():
        # shared fc 0 epilogue + ReLU
        h1 = jnp.maximum(acc_ref[...] + b1_ref[...], 0.0).astype(jnp.bfloat16)
        # shared fc 1 + ReLU
        h2 = jnp.dot(h1, w2_ref[...],
                     preferred_element_type=jnp.float32) + b2_ref[...]
        h2 = jnp.maximum(h2, 0.0).astype(jnp.bfloat16)
        # fused cls/reg head (lane-dense output)
        out_ref[...] = (jnp.dot(h2, wh_ref[...],
                                preferred_element_type=jnp.float32)
                        + bh_ref[...]).astype(out_ref.dtype)


# ----------------------------------------------------------------------------
# One-time parameter packing (off the hot path)
# ----------------------------------------------------------------------------
def pack_params(params, tk=2048):
    """Fuse cls/reg heads, pad head to 128 lanes, cast weights to bf16 and
    pre-pad W1 along the K (in_dim) axis to a multiple of the K tile."""
    in_dim, fc_out = params["w1"].shape

    # K tile for FC1 (multiple of 128 lanes, capped at the padded in_dim).
    tk_eff = int(min(_round_up(tk, 128), _round_up(in_dim, 128)))
    in_pad = int(_round_up(in_dim, tk_eff))

    w1 = params["w1"].astype(jnp.bfloat16)
    if in_pad != in_dim:
        w1 = jnp.pad(w1, ((0, in_pad - in_dim), (0, 0)))
    w2 = params["w2"].astype(jnp.bfloat16)
    b1 = params["b1"].astype(jnp.float32).reshape(1, fc_out)
    b2 = params["b2"].astype(jnp.float32).reshape(1, fc_out)

    wc, bc = params["wc"], params["bc"]
    wr, br = params["wr"], params["br"]
    num_classes = wc.shape[1]
    head_dim = num_classes + wr.shape[1]
    head_pad = int(_round_up(head_dim, 128))

    wh = jnp.concatenate([wc, wr], axis=1)
    bh = jnp.concatenate([bc.reshape(1, -1), br.reshape(1, -1)], axis=1)
    if head_pad != head_dim:
        wh = jnp.pad(wh, ((0, 0), (0, head_pad - head_dim)))
        bh = jnp.pad(bh, ((0, 0), (0, head_pad - head_dim)))

    return dict(
        w1=w1, b1=b1, w2=w2, b2=b2,
        wh=wh.astype(jnp.bfloat16), bh=bh.astype(jnp.float32),
        in_dim=in_dim, in_pad=in_pad, tk_eff=tk_eff, fc_out=fc_out,
        num_classes=num_classes, head_dim=head_dim, head_pad=head_pad,
    )


# ----------------------------------------------------------------------------
# Forward wrapper
# ----------------------------------------------------------------------------
def rbbox_head_forward(x_nchw, packed, tm=256):
    """x_nchw: (N, C, H, W) float32.  packed: output of pack_params()."""
    n = x_nchw.shape[0]
    x_flat = x_nchw.reshape(n, -1).astype(jnp.float32)   # == torch x.view(N, -1)
    in_dim = x_flat.shape[1]
    assert in_dim == packed["in_dim"], "input flatten dim != packed W1 rows"

    fc_out = packed["fc_out"]
    tk_eff = packed["tk_eff"]
    in_pad = packed["in_pad"]
    head_pad = packed["head_pad"]
    head_dim = packed["head_dim"]
    num_classes = packed["num_classes"]

    # ---- ROI (M) tiling: multiple of 16 rows (bf16 sublane packing) ---------
    tm_eff = int(max(16, min(_round_up(tm, 16), _round_up(n, 16))))
    n_pad = int(_round_up(n, tm_eff))
    if (n_pad != n) or (in_pad != in_dim):
        x_flat = jnp.pad(x_flat, ((0, n_pad - n), (0, in_pad - in_dim)))

    grid = (n_pad // tm_eff, in_pad // tk_eff)

    # ---- VMEM budget for this tile plan -------------------------------------
    bf16, f32 = 2, 4
    resident = ((fc_out * fc_out + fc_out * head_pad) * bf16     # W2, Wh (1 buf)
                + (2 * fc_out + head_pad) * f32)                 # b1, b2, bh
    streamed = (2 * tm_eff * tk_eff * f32                        # x (2 bufs)
                + 2 * tk_eff * fc_out * bf16                     # W1 chunk (2 bufs)
                + 2 * tm_eff * head_pad * f32)                   # out (2 bufs)
    scratch = tm_eff * fc_out * f32                              # FC1 accumulator
    temps = tm_eff * fc_out * (f32 + 2 * bf16)                   # h1/h2 temporaries
    try:
        phys_vmem = pltpu.get_tpu_info().vmem_capacity_bytes
    except Exception:
        phys_vmem = 64 << 20                                     # v7x worst case
    cap = int(phys_vmem * 0.75)
    need = resident + streamed + scratch + temps
    vmem_limit = int(min(max(int(1.5 * need) + (8 << 20), 32 << 20), cap))

    # ---- cost estimate (helps XLA overlap the kernel with producers) --------
    flops = 2 * n_pad * (in_pad * fc_out + fc_out * fc_out + fc_out * head_pad)
    bytes_accessed = (n_pad * in_pad * f32
                      + in_pad * fc_out * bf16
                      + fc_out * fc_out * bf16
                      + fc_out * head_pad * bf16
                      + (2 * fc_out + head_pad) * f32
                      + n_pad * head_pad * f32)
    cost = pl.CostEstimate(flops=int(flops), transcendentals=0,
                           bytes_accessed=int(bytes_accessed))

    # ---- pallas_call ---------------------------------------------------------
    out = pl.pallas_call(
        rbbox_head_kernel,
        out_shape=jax.ShapeDtypeStruct((n_pad, head_pad), jnp.float32),
        grid_spec=pltpu.PrefetchScalarGridSpec(
            num_scalar_prefetch=0,
            grid=grid,
            in_specs=[
                # streamed tiles (default double-buffering)
                pl.BlockSpec((tm_eff, tk_eff), lambda i, k: (i, k)),    # x (f32)
                pl.BlockSpec((tk_eff, fc_out), lambda i, k: (k, 0)),    # W1 chunk
                # resident params: explicitly single-buffered
                pl.BlockSpec((1, fc_out), lambda i, k: (0, 0),
                             pipeline_mode=pl.Buffered(1)),             # b1
                pl.BlockSpec((fc_out, fc_out), lambda i, k: (0, 0),
                             pipeline_mode=pl.Buffered(1)),             # W2
                pl.BlockSpec((1, fc_out), lambda i, k: (0, 0),
                             pipeline_mode=pl.Buffered(1)),             # b2
                pl.BlockSpec((fc_out, head_pad), lambda i, k: (0, 0),
                             pipeline_mode=pl.Buffered(1)),             # Wh (cls||reg)
                pl.BlockSpec((1, head_pad), lambda i, k: (0, 0),
                             pipeline_mode=pl.Buffered(1)),             # bh
            ],
            out_specs=pl.BlockSpec((tm_eff, head_pad), lambda i, k: (i, 0)),
            scratch_shapes=[pltpu.VMEM((tm_eff, fc_out), jnp.float32)],
        ),
        compiler_params=pltpu.CompilerParams(
            dimension_semantics=("parallel", "arbitrary"),
            vmem_limit_bytes=vmem_limit,
        ),
        cost_estimate=cost,
    )(x_flat, packed["w1"], packed["b1"], packed["w2"], packed["b2"],
      packed["wh"], packed["bh"])

    # slice padded rows / lanes back off
    cls_score = out[:n, :num_classes]
    rbbox_pred = out[:n, num_classes:head_dim]
    return cls_score, rbbox_pred


# ----------------------------------------------------------------------------
# Synthetic init + pure-JAX reference
# ----------------------------------------------------------------------------
def init_params(key, in_dim, fc_out, num_classes, out_dim_reg):
    """Deterministic synthetic init (shapes mirror the PyTorch module)."""
    ks = jax.random.split(key, 4)
    # shared fcs (xavier-ish scale); stored as (in, out) for x @ W
    w1 = jax.random.normal(ks[0], (in_dim, fc_out), jnp.float32) * (1.0 / jnp.sqrt(in_dim))
    b1 = jnp.zeros((1, fc_out), jnp.float32)
    w2 = jax.random.normal(ks[1], (fc_out, fc_out), jnp.float32) * (1.0 / jnp.sqrt(fc_out))
    b2 = jnp.zeros((1, fc_out), jnp.float32)
    # fc_cls: N(0, 0.01), fc_reg: N(0, 0.001), zero bias (as in init_weights)
    wc = jax.random.normal(ks[2], (fc_out, num_classes), jnp.float32) * 0.01
    bc = jnp.zeros((1, num_classes), jnp.float32)
    wr = jax.random.normal(ks[3], (fc_out, out_dim_reg * num_classes), jnp.float32) * 0.001
    br = jnp.zeros((1, out_dim_reg * num_classes), jnp.float32)
    return dict(w1=w1, b1=b1, w2=w2, b2=b2, wc=wc, bc=bc, wr=wr, br=br)


def reference_forward(x_nchw, p):
    """Pure-JAX reference matching the kernel's bf16-weights / f32-accum path."""
    x = x_nchw.reshape(x_nchw.shape[0], -1).astype(jnp.bfloat16)
    h1 = jnp.maximum(jnp.dot(x, p["w1"].astype(jnp.bfloat16),
                             preferred_element_type=jnp.float32) + p["b1"], 0.0)
    h1 = h1.astype(jnp.bfloat16)
    h2 = jnp.maximum(jnp.dot(h1, p["w2"].astype(jnp.bfloat16),
                             preferred_element_type=jnp.float32) + p["b2"], 0.0)
    h2 = h2.astype(jnp.bfloat16)
    cls = jnp.dot(h2, p["wc"].astype(jnp.bfloat16),
                  preferred_element_type=jnp.float32) + p["bc"]
    reg = jnp.dot(h2, p["wr"].astype(jnp.bfloat16),
                  preferred_element_type=jnp.float32) + p["br"]
    return cls, reg


if __name__ == "__main__":
    # Small config consistent with the module's defaults (scaled down):
    #   in_channels=4, roi_feat_size=8 -> flattened dim 256
    #   fc_out_channels=128, num_classes=16, out_dim_reg=5
    # TODO(synk): optional cls/reg conv/fc branches (num_*_convs/fcs > 0) are
    # not implemented; the default RBBoxHead config has none.
    N, C, H, W = 2, 4, 8, 8
    FC_OUT, NUM_CLASSES, OUT_DIM_REG = 128, 16, 5

    key = jax.random.PRNGKey(0)
    kx, kp = jax.random.split(key)
    x = jax.random.normal(kx, (N, C, H, W), jnp.float32)
    params = init_params(kp, C * H * W, FC_OUT, NUM_CLASSES, OUT_DIM_REG)
    packed = pack_params(params)                      # one-time packing
    jax.block_until_ready(packed)

    cls_score, rbbox_pred = rbbox_head_forward(x, packed)
    jax.block_until_ready((cls_score, rbbox_pred))

    # correctness check against pure-JAX reference on the same bf16 path
    ref_cls, ref_reg = reference_forward(x, params)
    assert cls_score.shape == (N, NUM_CLASSES)
    assert rbbox_pred.shape == (N, OUT_DIM_REG * NUM_CLASSES)
    assert jnp.allclose(cls_score, ref_cls, atol=2e-3, rtol=2e-3)
    assert jnp.allclose(rbbox_pred, ref_reg, atol=2e-3, rtol=2e-3)

    print("KERNEL_OK")
</pallas_src>

<mosaic_0001>
module attributes {stable_mosaic.version = 11 : i64} {
  func.func @rbbox_head_kernel(%arg0: i32, %arg1: i32, %arg2: memref<16x256xf32, #tpu.memory_space<vmem>>, %arg3: memref<256x128xbf16, #tpu.memory_space<vmem>>, %arg4: memref<1x128xf32, #tpu.memory_space<vmem>>, %arg5: memref<128x128xbf16, #tpu.memory_space<vmem>>, %arg6: memref<1x128xf32, #tpu.memory_space<vmem>>, %arg7: memref<128x128xbf16, #tpu.memory_space<vmem>>, %arg8: memref<1x128xf32, #tpu.memory_space<vmem>>, %arg9: memref<16x128xf32, #tpu.memory_space<vmem>>, %arg10: memref<16x128xf32, #tpu.memory_space<vmem>>) attributes {dimension_semantics = [#tpu.dimension_semantics<parallel>, #tpu.dimension_semantics<arbitrary>], iteration_bounds = array<i64: 1, 1>, scalar_prefetch = 0 : i64, scratch_operands = 1 : i64, tpu.core_type = #tpu.core_type<tc>, window_params = [{transform_indices = @transform_0, window_bounds = array<i64: 16, 256>}, {transform_indices = @transform_1, window_bounds = array<i64: 256, 128>}, {pipeline_mode = #tpu.pipeline_mode<synchronous>, transform_indices = @transform_2, window_bounds = array<i64: 1, 128>}, {pipeline_mode = #tpu.pipeline_mode<synchronous>, transform_indices = @transform_3, window_bounds = array<i64: 128, 128>}, {pipeline_mode = #tpu.pipeline_mode<synchronous>, transform_indices = @transform_4, window_bounds = array<i64: 1, 128>}, {pipeline_mode = #tpu.pipeline_mode<synchronous>, transform_indices = @transform_5, window_bounds = array<i64: 128, 128>}, {pipeline_mode = #tpu.pipeline_mode<synchronous>, transform_indices = @transform_6, window_bounds = array<i64: 1, 128>}, {transform_indices = @transform_7, window_bounds = array<i64: 16, 128>}]} {
    %c0_i32 = arith.constant 0 : i32
    %0 = arith.cmpi eq, %arg1, %c0_i32 : i32
    %1 = arith.extui %0 : i1 to i32
    %c0_i32_0 = arith.constant 0 : i32
    %2 = arith.cmpi ne, %1, %c0_i32_0 : i32
    scf.if %2 {
      %cst_10 = arith.constant 0.000000e+00 : f32
      %13 = vector.broadcast %cst_10 : f32 to vector<16x128xf32>
      %c0_11 = arith.constant 0 : index
      %c0_12 = arith.constant 0 : index
      %14 = vector.load %arg10[%c0_11, %c0_12] : memref<16x128xf32, #tpu.memory_space<vmem>>, vector<16x128xf32>
      tpu.vector_store %arg10[%c0_11, %c0_12], %13 {strides = array<i32>} : memref<16x128xf32, #tpu.memory_space<vmem>>, vector<16x128xf32>,
    } else {
    }
    %c0 = arith.constant 0 : index
    %c0_1 = arith.constant 0 : index
    %3 = vector.load %arg10[%c0, %c0_1] : memref<16x128xf32, #tpu.memory_space<vmem>>, vector<16x128xf32>
    %c0_2 = arith.constant 0 : index
    %c0_3 = arith.constant 0 : index
    %4 = vector.load %arg2[%c0_2, %c0_3] : memref<16x256xf32, #tpu.memory_space<vmem>>, vector<16x256xf32>
    %5 = arith.truncf %4 : vector<16x256xf32> to vector<16x256xbf16>
    %c0_4 = arith.constant 0 : index
    %c0_5 = arith.constant 0 : index
    %6 = vector.load %arg3[%c0_4, %c0_5] : memref<256x128xbf16, #tpu.memory_space<vmem>>, vector<256x128xbf16>
    %cst = arith.constant dense<0.000000e+00> : vector<16x128xf32>
    %7 = tpu.matmul %5, %6, %cst {dimension_numbers = #tpu.dot_dimension_numbers<[1], [0], [0], [1], [0, 0, 1, 1], [], []>} : vector<16x256xbf16>, vector<256x128xbf16>, vector<16x128xf32> -> vector<16x128xf32>
    %8 = arith.addf %3, %7 : vector<16x128xf32>
    %c0_6 = arith.constant 0 : index
    %c0_7 = arith.constant 0 : index
    %9 = vector.load %arg10[%c0_6, %c0_7] : memref<16x128xf32, #tpu.memory_space<vmem>>, vector<16x128xf32>
    tpu.vector_store %arg10[%c0_6, %c0_7], %8 {strides = array<i32>} : memref<16x128xf32, #tpu.memory_space<vmem>>, vector<16x128xf32>,
    %c0_i32_8 = arith.constant 0 : i32
    %10 = arith.cmpi eq, %arg1, %c0_i32_8 : i32
    %11 = arith.extui %10 : i1 to i32
    %c0_i32_9 = arith.constant 0 : i32
    %12 = arith.cmpi ne, %11, %c0_i32_9 : i32
    scf.if %12 {
      %c0_10 = arith.constant 0 : index
      %c0_11 = arith.constant 0 : index
      %13 = vector.load %arg10[%c0_10, %c0_11] : memref<16x128xf32, #tpu.memory_space<vmem>>, vector<16x128xf32>
      %c0_12 = arith.constant 0 : index
      %c0_13 = arith.constant 0 : index
      %14 = vector.load %arg4[%c0_12, %c0_13] : memref<1x128xf32, #tpu.memory_space<vmem>>, vector<1x128xf32>
      %15 = vector.broadcast %14 : vector<1x128xf32> to vector<16x128xf32>
      %16 = arith.addf %13, %15 : vector<16x128xf32>
      %cst_14 = arith.constant 0.000000e+00 : f32
      %17 = vector.broadcast %cst_14 : f32 to vector<16x128xf32>
      %18 = arith.maximumf %16, %17 : vector<16x128xf32>
      %19 = arith.truncf %18 : vector<16x128xf32> to vector<16x128xbf16>
      %c0_15 = arith.constant 0 : index
      %c0_16 = arith.constant 0 : index
      %20 = vector.load %arg5[%c0_15, %c0_16] : memref<128x128xbf16, #tpu.memory_space<vmem>>, vector<128x128xbf16>
      %cst_17 = arith.constant dense<0.000000e+00> : vector<16x128xf32>
      %21 = tpu.matmul %19, %20, %cst_17 {dimension_numbers = #tpu.dot_dimension_numbers<[1], [0], [0], [1], [0, 0, 1, 1], [], []>} : vector<16x128xbf16>, vector<128x128xbf16>, vector<16x128xf32> -> vector<16x128xf32>
      %c0_18 = arith.constant 0 : index
      %c0_19 = arith.constant 0 : index
      %22 = vector.load %arg6[%c0_18, %c0_19] : memref<1x128xf32, #tpu.memory_space<vmem>>, vector<1x128xf32>
      %23 = vector.broadcast %22 : vector<1x128xf32> to vector<16x128xf32>
      %24 = arith.addf %21, %23 : vector<16x128xf32>
      %cst_20 = arith.constant 0.000000e+00 : f32
      %25 = vector.broadcast %cst_20 : f32 to vector<16x128xf32>
      %26 = arith.maximumf %24, %25 : vector<16x128xf32>
      %27 = arith.truncf %26 : vector<16x128xf32> to vector<16x128xbf16>
      %c0_21 = arith.constant 0 : index
      %c0_22 = arith.constant 0 : index
      %28 = vector.load %arg7[%c0_21, %c0_22] : memref<128x128xbf16, #tpu.memory_space<vmem>>, vector<128x128xbf16>
      %cst_23 = arith.constant dense<0.000000e+00> : vector<16x128xf32>
      %29 = tpu.matmul %27, %28, %cst_23 {dimension_numbers = #tpu.dot_dimension_numbers<[1], [0], [0], [1], [0, 0, 1, 1], [], []>} : vector<16x128xbf16>, vector<128x128xbf16>, vector<16x128xf32> -> vector<16x128xf32>
      %c0_24 = arith.constant 0 : index
      %c0_25 = arith.constant 0 : index
      %30 = vector.load %arg8[%c0_24, %c0_25] : memref<1x128xf32, #tpu.memory_space<vmem>>, vector<1x128xf32>
      %31 = vector.broadcast %30 : vector<1x128xf32> to vector<16x128xf32>
      %32 = arith.addf %29, %31 : vector<16x128xf32>
      %c0_26 = arith.constant 0 : index
      %c0_27 = arith.constant 0 : index
      %33 = vector.load %arg9[%c0_26, %c0_27] : memref<16x128xf32, #tpu.memory_space<vmem>>, vector<16x128xf32>
      tpu.vector_store %arg9[%c0_26, %c0_27], %32 {strides = array<i32>} : memref<16x128xf32, #tpu.memory_space<vmem>>, vector<16x128xf32>,
    } else {
    }
    return
  }
  func.func @transform_0(%arg0: i32, %arg1: i32) -> (i32, i32) {
    %c0_i32 = arith.constant 0 : i32
    return %arg0, %arg1 : i32, i32
  }
  func.func @transform_1(%arg0: i32, %arg1: i32) -> (i32, i32) {
    %c0_i32 = arith.constant 0 : i32
    %c0_i32_0 = arith.constant 0 : i32
    return %arg1, %c0_i32 : i32, i32
  }
  func.func @transform_2(%arg0: i32, %arg1: i32) -> (i32, i32) {
    %c0_i32 = arith.constant 0 : i32
    %c0_i32_0 = arith.constant 0 : i32
    %c0_i32_1 = arith.constant 0 : i32
    return %c0_i32, %c0_i32_0 : i32, i32
  }
  func.func @transform_3(%arg0: i32, %arg1: i32) -> (i32, i32) {
    %c0_i32 = arith.constant 0 : i32
    %c0_i32_0 = arith.constant 0 : i32
    %c0_i32_1 = arith.constant 0 : i32
    return %c0_i32, %c0_i32_0 : i32, i32
  }
  func.func @transform_4(%arg0: i32, %arg1: i32) -> (i32, i32) {
    %c0_i32 = arith.constant 0 : i32
    %c0_i32_0 = arith.constant 0 : i32
    %c0_i32_1 = arith.constant 0 : i32
    return %c0_i32, %c0_i32_0 : i32, i32
  }
  func.func @transform_5(%arg0: i32, %arg1: i32) -> (i32, i32) {
    %c0_i32 = arith.constant 0 : i32
    %c0_i32_0 = arith.constant 0 : i32
    %c0_i32_1 = arith.constant 0 : i32
    return %c0_i32, %c0_i32_0 : i32, i32
  }
  func.func @transform_6(%arg0: i32, %arg1: i32) -> (i32, i32) {
    %c0_i32 = arith.constant 0 : i32
    %c0_i32_0 = arith.constant 0 : i32
    %c0_i32_1 = arith.constant 0 : i32
    return %c0_i32, %c0_i32_0 : i32, i32
  }
  func.func @transform_7(%arg0: i32, %arg1: i32) -> (i32, i32) {
    %c0_i32 = arith.constant 0 : i32
    %c0_i32_0 = arith.constant 0 : i32
    return %arg0, %c0_i32 : i32, i32
  }
}

</mosaic_0001>

<bundles_post_ra>
// kernel: tpu_custom_call.1
= control target key start
LH: loop header
LB: loop body
LE: loop exit
PB: predicated region body
PF: predicated region fallthrough
CT: control target
= control target key end

     0   :  { %12 = vsyncpa [#allocation4], 0  ;;  %s969_s0 = inlined_call_operand.hbm [shape: f32[16,256], index: 0, kind: input, shape index: {}]   ;;  %s970_s1 = inlined_call_operand.hbm [shape: bf16[256,128], index: 1, kind: input, shape index: {}]   ;;  %s971_s2 = inlined_call_operand.vmem [shape: f32[1,128], index: 2, kind: input, shape index: {}]   ;;  %s972_s3 = inlined_call_operand.hbm [shape: bf16[128,128], index: 3, kind: input, shape index: {}]   ;;  %s973_s4 = inlined_call_operand.vmem [shape: f32[1,128], index: 4, kind: input, shape index: {}]   ;;  %s974_s5 = inlined_call_operand.hbm [shape: bf16[128,128], index: 5, kind: input, shape index: {}]   ;;  %s975_s6 = inlined_call_operand.vmem [shape: f32[1,128], index: 6, kind: input, shape index: {}]   ;;  %s976_s7 = inlined_call_operand.hbm [shape: f32[16,128], index: 7, kind: output, shape index: {}]  }
   0x1   :  { %13 = vsyncpa [#allocation7], 0 }
   0x2   :  { %14 = vsyncpa [#allocation10], 0 }
   0x3   :  { %15 = vsyncpa [#allocation5], 0  ;;  %s813_s24 = smov [#allocation6]   ;;  %s695_s28 = scalar_lea.hbm %s970_s1, 2048 }
   0x4   :  { %s33_s25 = sshll.u32 %s813_s24, 4  ;;  %p696_p0 = scmp.ne.s32.totalorder %s970_s1, %s695_s28  ;;  %s34_s25 = int_to_ptr.vmem [resolvable:$true] %s33_s25 }
   0x5   :  { %p699_p1 = scmp.lt.u32.totalorder %s695_s28, %s970_s1 }
   0x7   :  { %p701_p2 = pnand %p699_p1, %p696_p0 }
   0x9   :  { %704 = shalt.err (!%p701_p2)
}
   0xa   :  { %s705_s10 = scalar_lea.vmem %s34_s25, 2048  ;;  %p710_p4 = scmp.lt.s32.totalorder %s34_s25, %s34_s25 }
   0xb   :  { %p706_p3 = scmp.ne.s32.totalorder %s34_s25, %s705_s10  ;;  %p711_p5 = scmp.lt.s32.totalorder %s705_s10, %s705_s10 }
   0xd   :  { %p712_p6 = por %p711_p5, %p710_p4 }
   0xf   :  { %p713_p7 = pnand %p712_p6, %p706_p3 }
  0x11   :  { %716 = shalt.err (!%p713_p7)
}
  0x12   :  { %s814_s11 = smov 64   ;;  %s815_s12 = smov 4  }
  0x13   :  { %39 = dma.hbm_to_vmem [thread:$0]  %s970_s1, 2048, %s34_s25, [#allocation7], %s814_s11, %s814_s11, %s815_s12  }
  0x14   :  { %s816_s15 = smov [#allocation3]   ;;  %s717_s19 = scalar_lea.hbm %s969_s0, 512 }
  0x15   :  { %s21_s16 = sshll.u32 %s816_s15, 4  ;;  %p718_p8 = scmp.ne.s32.totalorder %s969_s0, %s717_s19  ;;  %s22_s16 = int_to_ptr.vmem [resolvable:$true] %s21_s16 }
  0x16   :  { %p721_p9 = scmp.lt.u32.totalorder %s717_s19, %s969_s0 }
  0x18   :  { %p723_p10 = pnand %p721_p9, %p718_p8 }
  0x1a   :  { %726 = shalt.err (!%p723_p10)
}
  0x1b   :  { %s727_s24 = scalar_lea.vmem %s22_s16, 512  ;;  %p732_p12 = scmp.lt.s32.totalorder %s22_s16, %s22_s16 }
  0x1c   :  { %p728_p11 = scmp.ne.s32.totalorder %s22_s16, %s727_s24  ;;  %p733_p13 = scmp.lt.s32.totalorder %s727_s24, %s727_s24 }
  0x1e   :  { %p734_p0 = por %p733_p13, %p732_p12 }
  0x20   :  { %p735_p1 = pnand %p734_p0, %p728_p11 }
  0x22   :  { %738 = shalt.err (!%p735_p1)
}
  0x23   :  { %s817_s1 = smov 256   ;;  %s818_s25 = smov 16  }
  0x24   :  { %27 = dma.hbm_to_vmem [thread:$0]  %s969_s0, 512, %s22_s16, [#allocation4], %s817_s1, %s817_s1, %s818_s25  }
  0x25   :  { %s819_s28 = smov [#allocation8]   ;;  %s820_s30 = smov [#allocation9]  }
  0x26   :  { %s47_s29 = sshll.u32 %s819_s28, 4  ;;  %s61_s8 = sshll.u32 %s820_s30, 4  ;;  %s48_s29 = int_to_ptr.vmem [resolvable:$true] %s47_s29  ;;  %s893_s8 = int_to_ptr.vmem [resolvable:$true] %s61_s8 }
  0x27   :  { %s739_s13 = scalar_lea.hbm %s972_s3, 1024 }
  0x28   :  { %p740_p2 = scmp.ne.s32.totalorder %s972_s3, %s739_s13  ;;  %p743_p3 = scmp.lt.u32.totalorder %s739_s13, %s972_s3 }
  0x2a   :  { %p745_p4 = pnand %p743_p3, %p740_p2 }
  0x2c   :  { %748 = shalt.err (!%p745_p4)
}
  0x2d   :  { %s749_s0 = scalar_lea.vmem %s48_s29, 1024  ;;  %p754_p6 = scmp.lt.s32.totalorder %s48_s29, %s48_s29 }
  0x2e   :  { %p750_p5 = scmp.ne.s32.totalorder %s48_s29, %s749_s0  ;;  %p755_p7 = scmp.lt.s32.totalorder %s749_s0, %s749_s0 }
  0x30   :  { %p756_p8 = por %p755_p7, %p754_p6 }
  0x32   :  { %p757_p9 = pnand %p756_p8, %p750_p5 }
  0x34   :  { %760 = shalt.err (!%p757_p9)
}
  0x35   :  { %53 = dma.hbm_to_vmem [thread:$0]  %s972_s3, 1024, %s48_s29, [#allocation7], %s814_s11, %s814_s11, %s815_s12  }
  0x36   :  { %s761_s22 = scalar_lea.hbm %s974_s5, 1024 }
  0x37   :  { %p762_p10 = scmp.ne.s32.totalorder %s974_s5, %s761_s22  ;;  %p765_p11 = scmp.lt.u32.totalorder %s761_s22, %s974_s5 }
  0x39   :  { %p767_p12 = pnand %p765_p11, %p762_p10 }
  0x3b   :  { %770 = shalt.err (!%p767_p12)
}
  0x3c   :  { %s771_s26 = scalar_lea.vmem %s893_s8, 1024  ;;  %p776_p0 = scmp.lt.s32.totalorder %s893_s8, %s893_s8 }
  0x3d   :  { %p772_p13 = scmp.ne.s32.totalorder %s893_s8, %s771_s26  ;;  %p777_p1 = scmp.lt.s32.totalorder %s771_s26, %s771_s26 }
  0x3f   :  { %p778_p2 = por %p777_p1, %p776_p0 }
  0x41   :  { %p779_p3 = pnand %p778_p2, %p772_p13 }
  0x43   :  { %782 = shalt.err (!%p779_p3)
}
  0x44   :  { %67 = dma.hbm_to_vmem [thread:$0]  %s974_s5, 1024, %s893_s8, [#allocation10], %s814_s11, %s814_s11, %s815_s12  }
  0x45   :  { %805 = dma.done.wait [#allocation4], 512  }
  0x46   :  { %806 = vsyncadd [#allocation4], 4294966784 }
  0x47   :  { %807 = dma.done.wait [#allocation7], 3072  }
  0x48   :  { %808 = vsyncadd [#allocation7], 4294964224 }
  0x49   :  { %809 = dma.done.wait [#allocation10], 1024  }
  0x4a   :  { %810 = vsyncadd [#allocation10], 4294966272  ;;  %v821_v0 = vmov 0.0   ;;  %v663_v1 = vld [vmem:[#allocation6 + $0x40] sm:$0xff]   ;;  %v665_v3 = vld [vmem:[#allocation6 + $0x48] sm:$0xff]   ;;  %vm822_vm0 = vmmov 0  }
  0x4b   :  { %610 = vmatprep.subr.bf16.mxu1 %v821_v0  ;;  %v664_v2 = vld [vmem:[#allocation6] sm:$0xff]   ;;  %570 = vmatprep.subr.bf16.mxu0 %v663_v1  ;;  %v666_v4 = vld [vmem:[#allocation6 + $0x8] sm:$0xff]   ;;  %v667_v5 = vld [vmem:[#allocation6 + $0x50] sm:$0xff]   ;;  %s823_s30 = smov [#allocation11]  }
  0x4c   :  { %571 = vmatpush3.bf16.msra.mxu0 %v664_v2  ;;  %v668_v6 = vld [vmem:[#allocation6 + $0x10] sm:$0xff]   ;;  %v669_v7 = vld [vmem:[#allocation6 + $0x58] sm:$0xff]   ;;  %v671_v9 = vld [vmem:[#allocation6 + $0x60] sm:$0xff]   ;;  %626 = vmatprep.mubr.msk.bf16.mxu1 %vm822_vm0, %v821_v0  ;;  %s521_s8 = sshll.u32 %s823_s30, 4  ;;  %s522_s8 = int_to_ptr.vmem [resolvable:$true] %s521_s8 }
  0x4d   :  { %572 = vmatprep.subr.bf16.mxu0 %v665_v3  ;;  %v670_v8 = vld [vmem:[#allocation6 + $0x18] sm:$0xff]   ;;  %v672_v10 = vld [vmem:[#allocation6 + $0x20] sm:$0xff]   ;;  %v673_v11 = vld [vmem:[#allocation6 + $0x68] sm:$0xff]   ;;  %p788_p5 = scmp.lt.s32.totalorder %s522_s8, %s522_s8 }
  0x4e   :  { %v92_v12 = vld [vmem:[#allocation3 + $0x8] sm:$0xff]  ;;  %v94_v13 = vld [vmem:[#allocation3 + $0x18] sm:$0xff]  ;;  %v679_v16 = vld [vmem:[#allocation8] sm:$0xff]  }
  0x4f   :  { %v674_v14 = vld [vmem:[#allocation6 + $0x28] sm:$0xff]   ;;  %v96_v15 = vpack.c.bf16 %v94_v13, %v92_v12  ;;  %v675_v17 = vld [vmem:[#allocation6 + $0x70] sm:$0xff]   ;;  %611 = vmatpush3.bf16.msra.mxu1 %v679_v16  ;;  %v677_v20 = vld [vmem:[#allocation6 + $0x78] sm:$0xff]  }
  0x50   :  { %573 = vmatpush3.bf16.msra.mxu0 %v666_v4  ;;  %v680_v18 = vld [vmem:[#allocation8 + $0x8] sm:$0xff]   ;;  %v676_v19 = vld [vmem:[#allocation6 + $0x30] sm:$0xff]   ;;  %612 = vmatprep.subr.bf16.mxu1 %v821_v0  ;;  %v678_v22 = vld [vmem:[#allocation6 + $0x38] sm:$0xff]  }
  0x51   :  { %574 = vmatprep.subr.bf16.mxu0 %v667_v5  ;;  %257 = vmatprep.mubr.bf16.mxu0 %v96_v15  ;;  %v681_v21 = vld [vmem:[#allocation8 + $0x10] sm:$0xff]   ;;  %v91_v23 = vld [vmem:[#allocation3] sm:$0xff]  ;;  %v682_v25 = vld [vmem:[#allocation8 + $0x18] sm:$0xff]  }
  0x52   :  { %v93_v24 = vld [vmem:[#allocation3 + $0x10] sm:$0xff]  ;;  %v683_v27 = vld [vmem:[#allocation8 + $0x20] sm:$0xff]   ;;  %v684_v28 = vld [vmem:[#allocation8 + $0x28] sm:$0xff]  }
  0x53   :  { %613 = vmatpush3.bf16.msra.mxu1 %v680_v18  ;;  %v95_v26 = vpack.c.bf16 %v93_v24, %v91_v23  ;;  %v685_v29 = vld [vmem:[#allocation8 + $0x30] sm:$0xff]   ;;  %v686_v30 = vld [vmem:[#allocation8 + $0x38] sm:$0xff]   ;;  %v687_v31 = vld [vmem:[#allocation9] sm:$0xff]  }
  0x54   :  { %575 = vmatpush3.bf16.msra.mxu0 %v668_v6  ;;  %614 = vmatprep.subr.bf16.mxu1 %v821_v0  ;;  %v688_v32 = vld [vmem:[#allocation9 + $0x8] sm:$0xff]   ;;  %v689_v33 = vld [vmem:[#allocation9 + $0x10] sm:$0xff]   ;;  %v690_v34 = vld [vmem:[#allocation9 + $0x18] sm:$0xff]  }
  0x55   :  { %576 = vmatprep.subr.bf16.mxu0 %v669_v7  ;;  %v691_v35 = vld [vmem:[#allocation9 + $0x20] sm:$0xff]   ;;  %v692_v36 = vld [vmem:[#allocation9 + $0x28] sm:$0xff]   ;;  %v693_v49 = vld [vmem:[#allocation9 + $0x30] sm:$0xff]  }
  0x56   :  { %v551_v39 = vld [vmem:[%s971_s2] ss:$0 sm:$0xff]  ;;  %v694_v50 = vld [vmem:[#allocation9 + $0x38] sm:$0xff]  }
  0x57   :  { %615 = vmatpush3.bf16.msra.mxu1 %v681_v21  ;;  %v552_v51 = vld [vmem:[%s973_s4] ss:$0 sm:$0xff]  ;;  %s783_s4 = scalar_lea.vmem %s522_s8, 256 }
  0x58   :  { %577 = vmatpush3.bf16.msra.mxu0 %v670_v8  ;;  %616 = vmatprep.subr.bf16.mxu1 %v821_v0  ;;  %v561_v61 = vld [vmem:[%s975_s6] ss:$0 sm:$0xff]  ;;  %p784_p4 = scmp.ne.s32.totalorder %s522_s8, %s783_s4  ;;  %p789_p6 = scmp.lt.s32.totalorder %s783_s4, %s783_s4 }
  0x59   :  { %578 = vmatprep.subr.bf16.mxu0 %v671_v9 }
  0x5a   :  { %p790_p7 = por %p789_p6, %p788_p5 }
  0x5b   :  { %617 = vmatpush3.bf16.msra.mxu1 %v682_v25 }
  0x5c   :  { %579 = vmatpush3.bf16.msra.mxu0 %v672_v10  ;;  %618 = vmatprep.subr.bf16.mxu1 %v821_v0  ;;  %p791_p8 = pnand %p790_p7, %p784_p4 }
  0x5d   :  { %580 = vmatprep.subr.bf16.mxu0 %v673_v11 }
  0x5f   :  { %619 = vmatpush3.bf16.msra.mxu1 %v683_v27 }
  0x60   :  { %581 = vmatpush3.bf16.msra.mxu0 %v674_v14  ;;  %620 = vmatprep.subr.bf16.mxu1 %v821_v0 }
  0x61   :  { %582 = vmatprep.subr.bf16.mxu0 %v675_v17 }
  0x63   :  { %621 = vmatpush3.bf16.msra.mxu1 %v684_v28 }
  0x64   :  { %583 = vmatpush3.bf16.msra.mxu0 %v676_v19  ;;  %622 = vmatprep.subr.bf16.mxu1 %v821_v0 }
  0x65   :  { %584 = vmatprep.subr.bf16.mxu0 %v677_v20 }
  0x67   :  { %623 = vmatpush3.bf16.msra.mxu1 %v685_v29 }
  0x68   :  { %585 = vmatpush3.bf16.msra.mxu0 %v678_v22  ;;  %624 = vmatprep.subr.bf16.mxu1 %v821_v0 }
  0x69   :  { %630 = vmatprep.subr.bf16.mxu0 %v821_v0 }
  0x6b   :  { %258 = vmatmul.mubr.bf16.vlgmr.msra.gmra.mrb[0].mxu0 %v95_v26  ;;  %625 = vmatpush3.bf16.msra.mxu1 %v686_v30 }
  0x6c   :  { %646 = vmatprep.mubr.msk.bf16.mxu0 %vm822_vm0, %v821_v0  ;;  %631 = vmatpush3.bf16.msra.mxu0 %v687_v31 }
  0x6d   :  { %632 = vmatprep.subr.bf16.mxu0 %v821_v0 }
  0x70   :  { %633 = vmatpush3.bf16.msra.mxu0 %v688_v32 }
  0x71   :  { %634 = vmatprep.subr.bf16.mxu0 %v821_v0 }
  0x74   :  { %635 = vmatpush3.bf16.msra.mxu0 %v689_v33 }
  0x75   :  { %636 = vmatprep.subr.bf16.mxu0 %v821_v0 }
  0x78   :  { %637 = vmatpush3.bf16.msra.mxu0 %v690_v34 }
  0x79   :  { %638 = vmatprep.subr.bf16.mxu0 %v821_v0 }
  0x7c   :  { %639 = vmatpush3.bf16.msra.mxu0 %v691_v35 }
  0x7d   :  { %640 = vmatprep.subr.bf16.mxu0 %v821_v0 }
  0x80   :  { %641 = vmatpush3.bf16.msra.mxu0 %v692_v36 }
  0x81   :  { %642 = vmatprep.subr.bf16.mxu0 %v821_v0 }
  0x84   :  { %643 = vmatpush3.bf16.msra.mxu0 %v693_v49 }
  0x85   :  { %644 = vmatprep.subr.bf16.mxu0 %v821_v0 }
  0x88   :  { %645 = vmatpush3.bf16.msra.mxu0 %v694_v50 }
 0x13e   :  { %v586_v37 = vpop.f32.mrb[0].mxu0 }
 0x13f   :  { %v587_v38 = vpop.f32.mrb[1].mxu0 }
 0x140   :  { %v588_v40 = vadd.f32 %v587_v38, %v586_v37  ;;  %v589_v41 = vpop.f32.mrb[2].mxu0 }
 0x141   :  { %v590_v42 = vpop.f32.mrb[3].mxu0 }
 0x142   :  { %v282_v43 = vadd.f32 %v588_v40, %v551_v39  ;;  %v591_v44 = vadd.f32 %v590_v42, %v589_v41 }
 0x144   :  { %v283_v45 = vadd.f32 %v591_v44, %v551_v39  ;;  %v284_v46 = vmax.f32 %v282_v43, 0.0 }
 0x146   :  { %v285_v47 = vmax.f32 %v283_v45, 0.0 }
 0x148   :  { %v286_v48 = vpack.c.bf16 %v285_v47, %v284_v46 }
 0x14a   :  { %627 = vmatmul.mubr.bf16.vlgmr.msra.gmra.mrb[0].mxu1 %v286_v48 }
 0x21d   :  { %v392_v52 = vpop.f32.mrb[0].mxu1 }
 0x21e   :  { %v393_v53 = vadd.f32 %v552_v51, %v392_v52  ;;  %v628_v54 = vpop.f32.mrb[1].mxu1 }
 0x21f   :  { %v395_v55 = vpop.f32.mrb[2].mxu1 }
 0x220   :  { %v396_v56 = vadd.f32 %v552_v51, %v395_v55  ;;  %v629_v57 = vpop.f32.mrb[3].mxu1  ;;  %v399_v58 = vmax.f32 %v393_v53, 0.0 }
 0x222   :  { %v400_v59 = vmax.f32 %v396_v56, 0.0 }
 0x224   :  { %v401_v60 = vpack.c.bf16 %v400_v59, %v399_v58 }
 0x226   :  { %647 = vmatmul.mubr.bf16.vlgmr.msra.gmra.mrb[4].mxu0 %v401_v60 }
 0x2f9   :  { %v507_v62 = vpop.f32.mrb[4].mxu0 }
 0x2fa   :  { %v508_v63 = vadd.f32 %v561_v61, %v507_v62  ;;  %v648_v0 = vpop.f32.mrb[5].mxu0 }
 0x2fb   :  { %v510_v1 = vpop.f32.mrb[6].mxu0 }
 0x2fc   :  { %514 = vst [vmem:[#allocation11] sm:$0xff] %v508_v63  ;;  %v511_v2 = vadd.f32 %v561_v61, %v510_v1  ;;  %v649_v3 = vpop.f32.mrb[7].mxu0 }
 0x2fe   :  { %515 = vst [vmem:[#allocation11 + $0x8] sm:$0xff] %v511_v2 }
 0x2ff   :  { %794 = shalt.err (!%p791_p8)
}
 0x300   :  { %s795_s10 = scalar_lea.hbm %s976_s7, 256 }
 0x301   :  { %p796_p9 = scmp.ne.s32.totalorder %s976_s7, %s795_s10  ;;  %p799_p10 = scmp.lt.u32.totalorder %s795_s10, %s976_s7 }
 0x303   :  { %p801_p11 = pnand %p799_p10, %p796_p9 }
 0x305   :  { %804 = shalt.err (!%p801_p11)
}
 0x306   :  { %s824_s18 = smov 128   ;;  %s825_s0 = smov 8  }
 0x307   :  { %527 = dma.vmem_to_hbm [thread:$0]  %s522_s8, 256, %s976_s7, [#allocation5], %s824_s18, %s824_s18, %s825_s0  }
 0x308   :  { %811 = dma.done.wait [#allocation5], 256  }
 0x309   :  { %812 = vsyncadd [#allocation5], 4294967040 }
 0x30a   :  { %531 = vsyncpa [#allocation4], 1 }
 0x30b   :  { %532 = vsyncpa [#allocation7], 1 }
 0x30c   :  { %533 = vsyncpa [#allocation10], 1 }
 0x30d   :  { %534 = vsyncpa [#allocation5], 1 }

</bundles_post_ra>
